<compile_context>
chip_gen: v7x
topology: tpu7x:2x2x1
jax: 0.10.0
libtpu: 0.0.40
codegen_flags: <defaults>
</compile_context>

<pallas_src>
import jax
import jax.numpy as jnp
from jax.experimental import pallas as pl
from jax.experimental.pallas import tpu as pltpu

SEG_WEIGHT = 0.2
_SEG_PAD_LOGIT = -200.0   # softplus(-200) == 0 exactly in f32 -> padding adds 0


def _cdiv(a, b):
    return -(-a // b)


def _softplus(x):
    # Stable "x-only" part of BCE-with-logits: max(x,0) + log1p(exp(-|x|)).
    return jnp.maximum(x, 0.0) + jnp.log1p(jnp.exp(-jnp.abs(x)))


def _bce_with_logits(x, t):
    # Same stable formula PyTorch uses: max(x,0) - x*t + log(1 + exp(-|x|)).
    return _softplus(x) - x * t


# --------------------------------------------------------------------------- #
# Kernels: per-(batch, row-tile) partial BCE sums over the seg tensors.
# Each grid step writes its own (1, lanes) partial-sum output block, so both
# grid axes are independent ("parallel") and no init/finalize phases exist.
# --------------------------------------------------------------------------- #
def _train_seg_kernel(w_ref, pseg_ref, y1s_ref, y2s_ref, out_ref):
    """mixup branch: w1*BCE(x,y1) + w2*BCE(x,y2) with per-sample scalar w1/w2."""
    b = pl.program_id(0)
    # Per-sample scalar weights from SMEM:
    #   w[0, b] = lam       * (y1_cls[b, 3] != 1)
    #   w[1, b] = (1 - lam) * (y2_cls[b, 3] != 1)
    w1 = w_ref[0, b]
    w2 = w_ref[1, b]

    x = pseg_ref[0]                       # (tile_r, lanes)
    if x.dtype != jnp.float32:
        x = x.astype(jnp.float32)
    y1 = y1s_ref[0]
    if y1.dtype != jnp.float32:
        y1 = y1.astype(jnp.float32)
    y2 = y2s_ref[0]
    if y2.dtype != jnp.float32:
        y2 = y2.astype(jnp.float32)

    sp = _softplus(x)                     # single shared transcendental (EUP)
    loss = (w1 + w2) * sp - x * (w1 * y1 + w2 * y2)
    # Per-lane partial sums for this tile; final reduce happens in the wrapper.
    out_ref[0, 0] = jnp.sum(loss, axis=0, keepdims=True)


def _eval_seg_kernel(pseg_ref, tseg_ref, out_ref):
    """non-mixup branch: plain BCE-with-logits partial sums."""
    x = pseg_ref[0]
    if x.dtype != jnp.float32:
        x = x.astype(jnp.float32)
    y = tseg_ref[0]
    if y.dtype != jnp.float32:
        y = y.astype(jnp.float32)
    loss = _softplus(x) - x * y
    out_ref[0, 0] = jnp.sum(loss, axis=0, keepdims=True)


# --------------------------------------------------------------------------- #
# Host-side layout helpers
# --------------------------------------------------------------------------- #
def _seg_layout(n_per_sample):
    """Pick a lane-dense (rows, lanes) layout and row-tile for one sample.

    Rows are padded only to a multiple of 8; tile_r is a divisor of the padded
    row count whenever a decent divisor (<=1024, >=256 rows) exists, so for
    typical seg sizes there is zero extra padding and zero host-side copy.
    """
    if n_per_sample % 512 == 0 and n_per_sample >= 4096:
        lanes = 512
    elif n_per_sample >= 32768:
        lanes = 512
    else:
        lanes = 128
    rows = _cdiv(n_per_sample, lanes)
    rows8 = _cdiv(rows, 8) * 8            # sublane-align only
    cap = min(rows8, 1024)                # up to ~2-4 MiB logits per step

    tile_r = 8
    for cand in range(cap, 7, -8):        # largest mult-of-8 divisor <= cap
        if rows8 % cand == 0:
            tile_r = cand
            break
    if tile_r >= 256 or tile_r == rows8:
        return lanes, tile_r, rows8
    # No decent divisor: round rows up to a multiple of the cap instead
    # (waste < cap rows; padded elements contribute exactly 0 to the sum).
    tile_r = cap
    rows_pad = _cdiv(rows8, tile_r) * tile_r
    return lanes, tile_r, rows_pad


def _prep_seg(x, lanes, rows_pad, pad_value, dtype=None):
    """(B, ...) -> (B, rows_pad, lanes); pads only if needed (pad adds 0 loss)."""
    b = x.shape[0]
    flat = x.reshape(b, -1)
    if dtype is not None and flat.dtype != dtype:
        flat = flat.astype(dtype)
    n = flat.shape[1]
    n_pad = rows_pad * lanes
    if n_pad != n:
        flat = jnp.pad(flat, ((0, 0), (0, n_pad - n)),
                       constant_values=jnp.asarray(pad_value, flat.dtype))
    return flat.reshape(b, rows_pad, lanes)


def _compiler_params():
    return pltpu.CompilerParams(
        dimension_semantics=("parallel", "parallel"),
        vmem_limit_bytes=32 * 1024 * 1024)


def _seg_partials_train(w, pseg3, y1s3, y2s3, tile_r, lanes):
    B, rows_pad, _ = pseg3.shape
    s_tiles = rows_pad // tile_r
    seg_spec = pl.BlockSpec((1, tile_r, lanes), lambda b, s: (b, s, 0))
    # TODO(synk): sweep pipeline_mode=pl.Buffered(3) on seg specs if xprof shows
    # exposed DMA at step boundaries on v7x.
    return pl.pallas_call(
        _train_seg_kernel,
        out_shape=jax.ShapeDtypeStruct((B, s_tiles, 1, lanes), jnp.float32),
        grid=(B, s_tiles),
        in_specs=[
            pl.BlockSpec((2, B), lambda b, s: (0, 0),
                         memory_space=pltpu.MemorySpace.SMEM),
            seg_spec, seg_spec, seg_spec,
        ],
        out_specs=pl.BlockSpec((1, 1, 1, lanes), lambda b, s: (b, s, 0, 0)),
        compiler_params=_compiler_params(),
    )(w, pseg3, y1s3, y2s3)


def _seg_partials_eval(pseg3, tseg3, tile_r, lanes):
    B, rows_pad, _ = pseg3.shape
    s_tiles = rows_pad // tile_r
    seg_spec = pl.BlockSpec((1, tile_r, lanes), lambda b, s: (b, s, 0))
    return pl.pallas_call(
        _eval_seg_kernel,
        out_shape=jax.ShapeDtypeStruct((B, s_tiles, 1, lanes), jnp.float32),
        grid=(B, s_tiles),
        in_specs=[seg_spec, seg_spec],
        out_specs=pl.BlockSpec((1, 1, 1, lanes), lambda b, s: (b, s, 0, 0)),
        compiler_params=_compiler_params(),
    )(pseg3, tseg3)


# --------------------------------------------------------------------------- #
# Public wrapper (equivalent of MixHybridClsSegLoss.forward)
# --------------------------------------------------------------------------- #
def mix_hybrid_cls_seg_loss(p, t, seg_weight=SEG_WEIGHT,
                            seg_target_dtype=jnp.bfloat16,
                            seg_logit_dtype=None,
                            min_pallas_elems=65536):
    """JAX/Pallas equivalent of MixHybridClsSegLoss.forward.

    seg_target_dtype: dtype the seg masks are streamed in as (bf16 is exact for
      binary {0,1} masks and halves target HBM traffic; use jnp.float32 for soft
      targets).
    seg_logit_dtype: optional dtype to stream the seg logits in (None = keep
      incoming dtype; bf16 cuts logit HBM traffic on v5e/v6e).
    min_pallas_elems: per-sample seg element count below which the whole loss is
      computed in plain jnp (grid/pipeline setup overhead dominates tiny maps).
    """
    if isinstance(t, dict) and 'lam' in t:
        # forward_train branch: p = (pcls, pseg)
        pcls, pseg = p
        lam = jnp.asarray(t['lam'], jnp.float32)
        y1c = t['y1_cls'].astype(jnp.float32)
        y2c = t['y2_cls'].astype(jnp.float32)
        B = pcls.shape[0]
        seg_count = int(pseg.size)
        n_per_sample = seg_count // B

        # Classification term (tiny) in plain XLA.  Exact mixup because
        # BCE-with-logits is affine in the target.
        ycls_mix = lam * y1c + (1.0 - lam) * y2c
        cls_loss = jnp.mean(_bce_with_logits(pcls.astype(jnp.float32), ycls_mix))

        # Per-sample seg weights; class 3 == "no-seg" zeroes that sample's term.
        keep1 = (y1c[:, 3] != 1.0).astype(jnp.float32)
        keep2 = (y2c[:, 3] != 1.0).astype(jnp.float32)
        w1 = lam * keep1
        w2 = (1.0 - lam) * keep2

        if n_per_sample < min_pallas_elems:
            # Tiny seg maps: XLA fusion beats Pallas setup overhead.
            x = pseg.astype(jnp.float32).reshape(B, -1)
            y1 = t['y1_seg'].astype(jnp.float32).reshape(B, -1)
            y2 = t['y2_seg'].astype(jnp.float32).reshape(B, -1)
            sp = _softplus(x)
            seg = (w1 + w2)[:, None] * sp \
                - x * (w1[:, None] * y1 + w2[:, None] * y2)
            return cls_loss + seg_weight * (jnp.sum(seg) / seg_count)

        lanes, tile_r, rows_pad = _seg_layout(n_per_sample)
        pseg3 = _prep_seg(pseg, lanes, rows_pad, _SEG_PAD_LOGIT, seg_logit_dtype)
        y1s3 = _prep_seg(t['y1_seg'], lanes, rows_pad, 0.0, seg_target_dtype)
        y2s3 = _prep_seg(t['y2_seg'], lanes, rows_pad, 0.0, seg_target_dtype)
        w = jnp.stack([w1, w2], axis=0)                      # (2, B) f32

        partials = _seg_partials_train(w, pseg3, y1s3, y2s3, tile_r, lanes)
        seg_loss = jnp.sum(partials) / seg_count
        return cls_loss + seg_weight * seg_loss
    else:
        # eval branch: p = (pseg, pcls), t = (tcls, tseg)
        pseg, pcls = p
        tcls, tseg = t
        B = pseg.shape[0]
        seg_count = int(pseg.size)
        n_per_sample = seg_count // B

        cls_loss = jnp.mean(_bce_with_logits(pcls.astype(jnp.float32),
                                             tcls.astype(jnp.float32)))

        if n_per_sample < min_pallas_elems:
            seg_loss = jnp.mean(_bce_with_logits(pseg.astype(jnp.float32),
                                                 tseg.astype(jnp.float32)))
            return cls_loss + seg_weight * seg_loss

        lanes, tile_r, rows_pad = _seg_layout(n_per_sample)
        pseg3 = _prep_seg(pseg, lanes, rows_pad, _SEG_PAD_LOGIT, seg_logit_dtype)
        tseg3 = _prep_seg(tseg, lanes, rows_pad, 0.0, seg_target_dtype)

        partials = _seg_partials_eval(pseg3, tseg3, tile_r, lanes)
        seg_loss = jnp.sum(partials) / seg_count
        return cls_loss + seg_weight * seg_loss


# ----------------------------- pure-JAX reference -----------------------------
def _ref_train(p, t, seg_weight=SEG_WEIGHT):
    lam = jnp.float32(t['lam'])
    pcls, pseg = p
    pcls = pcls.astype(jnp.float32)
    cls_loss = lam * _bce_with_logits(pcls, t['y1_cls'].astype(jnp.float32)) + \
        (1.0 - lam) * _bce_with_logits(pcls, t['y2_cls'].astype(jnp.float32))
    pseg = pseg.astype(jnp.float32)
    s1 = _bce_with_logits(pseg, t['y1_seg'].astype(jnp.float32))
    s2 = _bce_with_logits(pseg, t['y2_seg'].astype(jnp.float32))
    m1 = (t['y1_cls'][:, 3] == 1.0)[:, None, None, None]
    m2 = (t['y2_cls'][:, 3] == 1.0)[:, None, None, None]
    s1 = jnp.where(m1, 0.0, s1)
    s2 = jnp.where(m2, 0.0, s2)
    seg_loss = lam * s1 + (1.0 - lam) * s2
    return jnp.mean(cls_loss) + seg_weight * jnp.mean(seg_loss)


def _ref_eval(p, t, seg_weight=SEG_WEIGHT):
    pseg, pcls = p
    tcls, tseg = t
    return jnp.mean(_bce_with_logits(pcls.astype(jnp.float32), tcls.astype(jnp.float32))) + \
        seg_weight * jnp.mean(_bce_with_logits(pseg.astype(jnp.float32), tseg.astype(jnp.float32)))


if __name__ == "__main__":
    key = jax.random.PRNGKey(0)
    B, C_CLS, C_SEG, H, W = 2, 4, 1, 16, 16

    k = jax.random.split(key, 8)
    pcls = jax.random.normal(k[0], (B, C_CLS), jnp.float32)
    pseg = jax.random.normal(k[1], (B, C_SEG, H, W), jnp.float32)

    # Binary class targets; force sample 0 of y1 to have class-3 == 1 to
    # exercise the seg-loss zeroing path.
    y1_cls = (jax.random.uniform(k[2], (B, C_CLS)) > 0.5).astype(jnp.float32)
    y1_cls = y1_cls.at[0, 3].set(1.0)
    y2_cls = (jax.random.uniform(k[3], (B, C_CLS)) > 0.5).astype(jnp.float32)
    y2_cls = y2_cls.at[:, 3].set(0.0)
    y1_seg = (jax.random.uniform(k[4], (B, C_SEG, H, W)) > 0.5).astype(jnp.float32)
    y2_seg = (jax.random.uniform(k[5], (B, C_SEG, H, W)) > 0.5).astype(jnp.float32)

    lam = 0.7

    # --- training (mixup) branch: force the Pallas path at this small size ---
    t_train = {'lam': lam, 'y1_cls': y1_cls, 'y2_cls': y2_cls,
               'y1_seg': y1_seg, 'y2_seg': y2_seg}
    loss_train = mix_hybrid_cls_seg_loss((pcls, pseg), t_train,
                                         min_pallas_elems=0)
    loss_train = jax.block_until_ready(loss_train)
    ref_train = _ref_train((pcls, pseg), t_train)

    # --- eval (plain) branch, Pallas path ---
    tcls = (jax.random.uniform(k[6], (B, C_CLS)) > 0.5).astype(jnp.float32)
    tseg = (jax.random.uniform(k[7], (B, C_SEG, H, W)) > 0.5).astype(jnp.float32)
    loss_eval = mix_hybrid_cls_seg_loss((pseg, pcls), (tcls, tseg),
                                        min_pallas_elems=0)
    loss_eval = jax.block_until_ready(loss_eval)
    ref_eval = _ref_eval((pseg, pcls), (tcls, tseg))

    # --- default-threshold small-tensor fallback (pure jnp) ---
    fb_train = jax.block_until_ready(mix_hybrid_cls_seg_loss((pcls, pseg), t_train))
    fb_eval = jax.block_until_ready(mix_hybrid_cls_seg_loss((pseg, pcls), (tcls, tseg)))

    assert jnp.allclose(loss_train, ref_train, rtol=1e-5, atol=1e-5), \
        (loss_train, ref_train)
    assert jnp.allclose(loss_eval, ref_eval, rtol=1e-5, atol=1e-5), \
        (loss_eval, ref_eval)
    assert jnp.allclose(fb_train, ref_train, rtol=1e-5, atol=1e-5), \
        (fb_train, ref_train)
    assert jnp.allclose(fb_eval, ref_eval, rtol=1e-5, atol=1e-5), \
        (fb_eval, ref_eval)

    print("KERNEL_OK")
</pallas_src>

<mosaic_0001>
module attributes {stable_mosaic.version = 11 : i64} {
  func.func @_train_seg_kernel(%arg0: i32, %arg1: i32, %arg2: memref<2x2xf32, #tpu.memory_space<smem>>, %arg3: memref<1x8x128xf32, #tpu.memory_space<vmem>>, %arg4: memref<1x8x128xbf16, #tpu.memory_space<vmem>>, %arg5: memref<1x8x128xbf16, #tpu.memory_space<vmem>>, %arg6: memref<1x1x1x128xf32, #tpu.memory_space<vmem>>) attributes {dimension_semantics = [#tpu.dimension_semantics<parallel>, #tpu.dimension_semantics<parallel>], iteration_bounds = array<i64: 2, 1>, scalar_prefetch = 0 : i64, scratch_operands = 0 : i64, tpu.core_type = #tpu.core_type<tc>, window_params = [{transform_indices = @transform_0, window_bounds = array<i64: 2, 2>}, {transform_indices = @transform_1, window_bounds = array<i64: 1, 8, 128>}, {transform_indices = @transform_2, window_bounds = array<i64: 1, 8, 128>}, {transform_indices = @transform_3, window_bounds = array<i64: 1, 8, 128>}, {transform_indices = @transform_4, window_bounds = array<i64: 1, 1, 1, 128>}]} {
    %c0 = arith.constant 0 : index
    %0 = arith.index_cast %arg0 : i32 to index
    %1 = memref.load %arg2[%c0, %0] : memref<2x2xf32, #tpu.memory_space<smem>>
    %c1 = arith.constant 1 : index
    %2 = arith.index_cast %arg0 : i32 to index
    %3 = memref.load %arg2[%c1, %2] : memref<2x2xf32, #tpu.memory_space<smem>>
    %c0_0 = arith.constant 0 : index
    %c0_1 = arith.constant 0 : index
    %c0_2 = arith.constant 0 : index
    %4 = vector.load %arg3[%c0_0, %c0_1, %c0_2] : memref<1x8x128xf32, #tpu.memory_space<vmem>>, vector<1x8x128xf32>
    %5 = vector.shape_cast %4 : vector<1x8x128xf32> to vector<8x128xf32>
    %c0_3 = arith.constant 0 : index
    %c0_4 = arith.constant 0 : index
    %c0_5 = arith.constant 0 : index
    %6 = vector.load %arg4[%c0_3, %c0_4, %c0_5] : memref<1x8x128xbf16, #tpu.memory_space<vmem>>, vector<1x8x128xbf16>
    %7 = vector.shape_cast %6 : vector<1x8x128xbf16> to vector<8x128xbf16>
    %8 = arith.extf %7 : vector<8x128xbf16> to vector<8x128xf32>
    %c0_6 = arith.constant 0 : index
    %c0_7 = arith.constant 0 : index
    %c0_8 = arith.constant 0 : index
    %9 = vector.load %arg5[%c0_6, %c0_7, %c0_8] : memref<1x8x128xbf16, #tpu.memory_space<vmem>>, vector<1x8x128xbf16>
    %10 = vector.shape_cast %9 : vector<1x8x128xbf16> to vector<8x128xbf16>
    %11 = arith.extf %10 : vector<8x128xbf16> to vector<8x128xf32>
    %cst = arith.constant 0.000000e+00 : f32
    %12 = vector.broadcast %cst : f32 to vector<8x128xf32>
    %13 = arith.maximumf %5, %12 : vector<8x128xf32>
    %14 = math.absf %5 : vector<8x128xf32>
    %cst_9 = arith.constant 0.000000e+00 : f32
    %15 = vector.broadcast %cst_9 : f32 to vector<8x128xf32>
    %16 = arith.subf %15, %14 : vector<8x128xf32>
    %17 = math.exp %16 : vector<8x128xf32>
    %18 = math.log1p %17 : vector<8x128xf32>
    %19 = arith.addf %13, %18 : vector<8x128xf32>
    %20 = arith.addf %1, %3 : f32
    %21 = vector.broadcast %20 : f32 to vector<8x128xf32>
    %22 = arith.mulf %21, %19 : vector<8x128xf32>
    %23 = vector.broadcast %1 : f32 to vector<8x128xf32>
    %24 = arith.mulf %23, %8 : vector<8x128xf32>
    %25 = vector.broadcast %3 : f32 to vector<8x128xf32>
    %26 = arith.mulf %25, %11 : vector<8x128xf32>
    %27 = arith.addf %24, %26 : vector<8x128xf32>
    %28 = arith.mulf %5, %27 : vector<8x128xf32>
    %29 = arith.subf %22, %28 : vector<8x128xf32>
    %cst_10 = arith.constant dense<0.000000e+00> : vector<128xf32>
    %30 = vector.multi_reduction <add>, %29, %cst_10 [0] : vector<8x128xf32> to vector<128xf32>
    %31 = vector.shape_cast %30 : vector<128xf32> to vector<1x128xf32>
    %c0_11 = arith.constant 0 : index
    %c0_12 = arith.constant 0 : index
    %c0_13 = arith.constant 0 : index
    %c0_14 = arith.constant 0 : index
    %32 = vector.load %arg6[%c0_11, %c0_12, %c0_13, %c0_14] : memref<1x1x1x128xf32, #tpu.memory_space<vmem>>, vector<1x1x1x128xf32>
    %33 = vector.shape_cast %32 : vector<1x1x1x128xf32> to vector<1x128xf32>
    %34 = vector.shape_cast %31 : vector<1x128xf32> to vector<1x1x1x128xf32>
    tpu.vector_store %arg6[%c0_11, %c0_12, %c0_13, %c0_14], %34 {strides = array<i32>} : memref<1x1x1x128xf32, #tpu.memory_space<vmem>>, vector<1x1x1x128xf32>,
    return
  }
  func.func @transform_0(%arg0: i32, %arg1: i32) -> (i32, i32) {
    %c0_i32 = arith.constant 0 : i32
    %c0_i32_0 = arith.constant 0 : i32
    %c0_i32_1 = arith.constant 0 : i32
    return %c0_i32, %c0_i32_0 : i32, i32
  }
  func.func @transform_1(%arg0: i32, %arg1: i32) -> (i32, i32, i32) {
    %c0_i32 = arith.constant 0 : i32
    %c0_i32_0 = arith.constant 0 : i32
    return %arg0, %arg1, %c0_i32 : i32, i32, i32
  }
  func.func @transform_2(%arg0: i32, %arg1: i32) -> (i32, i32, i32) {
    %c0_i32 = arith.constant 0 : i32
    %c0_i32_0 = arith.constant 0 : i32
    return %arg0, %arg1, %c0_i32 : i32, i32, i32
  }
  func.func @transform_3(%arg0: i32, %arg1: i32) -> (i32, i32, i32) {
    %c0_i32 = arith.constant 0 : i32
    %c0_i32_0 = arith.constant 0 : i32
    return %arg0, %arg1, %c0_i32 : i32, i32, i32
  }
  func.func @transform_4(%arg0: i32, %arg1: i32) -> (i32, i32, i32, i32) {
    %c0_i32 = arith.constant 0 : i32
    %c0_i32_0 = arith.constant 0 : i32
    %c0_i32_1 = arith.constant 0 : i32
    return %arg0, %arg1, %c0_i32, %c0_i32_0 : i32, i32, i32, i32
  }
}

</mosaic_0001>

<bundles_post_ra>
// kernel: tpu_custom_call.1
= control target key start
LH: loop header
LB: loop body
LE: loop exit
PB: predicated region body
PF: predicated region fallthrough
CT: control target
= control target key end

     0   :  { %s1050_s0 = inlined_call_operand.hbm [shape: f32[2,2], index: 0, kind: input, shape index: {}]   ;;  %s1051_s1 = inlined_call_operand.hbm [shape: f32[2,8,128], index: 1, kind: input, shape index: {}]   ;;  %s1052_s2 = inlined_call_operand.hbm [shape: bf16[2,8,128], index: 2, kind: input, shape index: {}]   ;;  %s1053_s3 = inlined_call_operand.vmem [shape: bf16[2,8,128], index: 3, kind: input, shape index: {}]   ;;  %s1054_s4 = inlined_call_operand.hbm [shape: f32[2,1,1,128], index: 4, kind: output, shape index: {}]  }
   0x1   :  { %1060 = sst [smem:[#allocation14_spill]] %s1050_s0 }
   0x2   :  { %9 = vsyncpa [#allocation5], 0 }
   0x3   :  { %10 = vsyncpa [#allocation3], 0 }
   0x4   :  { %12 = vsyncpa [#allocation3 + $0x1], 0 }
   0x5   :  { %13 = vsyncpa [#allocation8], 0 }
   0x6   :  { %15 = vsyncpa [#allocation8 + $0x1], 0 }
   0x7   :  { %16 = vsyncpa [#allocation4], 0 }
   0x8   :  { %18 = vsyncpa [#allocation4 + $0x1], 0  ;;  %s792_s15 = smov 0   ;;  %s794_s16 = smov 0  }
   0x9   :  { %s796_s17 = smov 0   ;;  %s798_s18 = smov 0  }
   0xa   :  { %s800_s19 = smov 0   ;;  %s802_s20 = smov 0  }
   0xb LB: > { %s496_s21 = sadd.s32 4294967295, %s761_s20   ;;  %s497_s22 = sadd.s32 4294967294, %s761_s20   ;;  %s761_s20 = sphi %s802_s20, %s24_s20   ;;  %s757_s19 = sphi %s800_s19, %s1079_s19   ;;  %s753_s18 = sphi %s798_s18, %s1078_s18   ;;  %s749_s17 = sphi %s796_s17, %s1077_s17   ;;  %s745_s16 = sphi %s794_s16, %s1076_s16   ;;  %s741_s15 = sphi %s792_s15, %s1075_s15  }
   0xc   : > { %s66_s23 = sadd.s32 1, %s749_s17  ;;  %p73_p0 = scmp.ne.s32.totalorder %s749_s17, %s745_s16 }
   0xd   : > { %p79_p1 = scmp.ne.s32.totalorder %s745_s16, %s741_s15  ;;  %p829_p2 = scmp.eq.s32.totalorder %s496_s21, 0 }
   0xe   : > { %p161_p3 = scmp.eq.s32.totalorder %s496_s21, 1  ;;  %p167_p4 = scmp.eq.s32.totalorder %s497_s22, 1 }
   0xf   : > { %s1061_s24 = scalar_select %p829_p2, 1, 0 }
  0x10   : > { %p835_p5 = por %p829_p2, %p79_p1  ;;  %p498_p6 = scmp.ge.s32.totalorder %s761_s20, 1 }
  0x11   : > { %p843_p7 = por %p161_p3, %p73_p0  ;;  %p847_p8 = por %p167_p4, %p79_p1 }
  0x12   : > { %s1062_s25 = scalar_select %p835_p5, 1, 0 }
  0x13   : > { %s1063_s26 = scalar_select %p843_p7, 1, 0 }
  0x14   : > { %s1064_s27 = scalar_select %p847_p8, 1, 0 }
  0x15   : > { %p174_p9 = scmp.lt.s32.totalorder %s761_s20, 3  ;;  %p74_p12 = scmp.eq.s32.totalorder %s761_s20, 0 }
  0x16   : > { %s36_s29 = sadd.s32 1, %s757_s19  ;;  %p542_p4 = scmp.lt.s32.totalorder %s761_s20, 2 }
  0x17   : > { %p853_p11 = pnand %p498_p6, %p174_p9  ;;  %p38_p5 = scmp.ge.s32.totalorder %s36_s29, 2 }
  0x18   : > { %p864_p3 = por %p74_p12, %p73_p0  ;;  %s874_s5 = sand.u32 1, %s749_s17  }
  0x19   : > { %s1065_s28 = scalar_select %p853_p11, 1, 0 }
  0x1a   : > { %p526_p13 = pneg %p853_p11  ;;  %s1081_s29 = smov (%p38_p5, %s36_s29), 0 }
  0x1b   : > { %s1067_s0 = sld [smem:[#allocation14_spill]] }
  0x1c   : > { %p527_p1 = pnand %p526_p13, %p829_p2 }
  0x1e   : > { %p600_p9 = pneg %p527_p1 }
  0x21   : > { %s598_s8 = scalar_lea.hbm %s1067_s0, 32 }
  0x22   : > { %p599_p6 = scmp.ne.s32.totalorder %s1067_s0, %s598_s8  ;;  %p605_p13 = scmp.lt.u32.totalorder %s598_s8, %s1067_s0 }
  0x24   : > { %p601_p0 = pnand %p600_p9, %p599_p6 }
  0x26   : > { %p602_p12 = pneg %p601_p0 }
  0x28   : > { %p607_p10 = pnand %p605_p13, %p602_p12 }
  0x2a   : > { %610 = shalt.err (!%p607_p10)
}
  0x2b   : > { %s763_s13 = smov [#allocation2]   ;;  %s61_s22 = ssub.s32 %s757_s19, %s1081_s29 }
  0x2c   : > { %529 = dma.hbm_to_smem (!%p527_p1), %s1067_s0, 32, %s763_s13, [#allocation5]  }
  0x2d   : > { %p64_p5 = scmp.eq.s32.totalorder %s61_s22, 0  ;;  %s501_s6 = sshll.u32 %s874_s5, 3 }
  0x2e   : > { %s502_s7 = sshll.u32 %s757_s19, 7  ;;  %s200_s12 = scalar_lea.vmem [#allocation6], %s501_s6 }
  0x2f   : > { %s895_s8 = scalar_select %p64_p5, %s749_s17, %s66_s23  }
  0x30   : > { %s900_s11 = scalar_lea.hbm %s1051_s1, %s502_s7  ;;  %s208_s14 = sshll.u32 %s200_s12, 4  ;;  %s902_s14 = int_to_ptr.vmem [resolvable:$true] %s208_s14 }
  0x31   : > { %p908_p10 = pnand %p542_p4, %p864_p3  ;;  %s503_s23 = sshll.u32 %s874_s5, 2 }
  0x32   : > { %s197_s21 = scalar_lea.sflag [#allocation3], %s874_s5  ;;  %s611_s22 = scalar_lea.hbm %s900_s11, 128 }
  0x33   : > { %p612_p1 = scmp.ne.s32.totalorder %s900_s11, %s611_s22  ;;  %p613_p6 = pneg %p908_p10 }
  0x34   : > { %s616_s30 = scalar_lea.hbm %s1051_s1, 256  ;;  %p617_p3 = scmp.lt.u32.totalorder %s900_s11, %s1051_s1 }
  0x35   : > { %p614_p9 = pnand %p613_p6, %p612_p1  ;;  %p618_p4 = scmp.lt.u32.totalorder %s616_s30, %s611_s22 }
  0x36   : > { %p620_p13 = scmp.lt.u32.totalorder %s611_s22, %s900_s11 }
  0x37   : > { %p615_p0 = pneg %p614_p9  ;;  %p619_p12 = por %p618_p4, %p617_p3 }
  0x39   : > { %p621_p5 = por %p620_p13, %p619_p12 }
  0x3b   : > { %p622_p8 = pnand %p621_p5, %p615_p0 }
  0x3d   : > { %625 = shalt.err (!%p622_p8)
}
  0x3e   : > { %s626_s12 = scalar_lea.vmem %s902_s14, 128  ;;  %s764_s6 = smov [#allocation6]  }
  0x3f   : > { %p627_p1 = scmp.ne.s32.totalorder %s902_s14, %s626_s12  ;;  %s631_s7 = sshll.u32 %s764_s6, 4  ;;  %s632_s7 = int_to_ptr.vmem [resolvable:$false] %s631_s7 }
  0x40   : > { %s633_s9 = scalar_lea.vmem %s632_s7, 256  ;;  %p634_p2 = scmp.lt.s32.totalorder %s902_s14, %s632_s7 }
  0x41   : > { %p629_p9 = pnand %p627_p1, %p613_p6  ;;  %p635_p3 = scmp.lt.s32.totalorder %s633_s9, %s626_s12 }
  0x43   : > { %p630_p7 = pneg %p629_p9  ;;  %p636_p4 = por %p635_p3, %p634_p2 }
  0x45   : > { %p637_p12 = pnand %p636_p4, %p630_p7 }
  0x47   : > { %640 = shalt.err (!%p637_p12)
}
  0x48   : > { %533 = dma.hbm_to_vmem [thread:$0]  (!%p908_p10), %s900_s11, 128, %s902_s14, %s197_s21  }
  0x49   : > { %s504_s22 = sshll.u32 %s757_s19, 6  ;;  %s219_s30 = scalar_lea.vmem [#allocation7], %s503_s23 }
  0x4a   : > { %s227_s10 = sshll.u32 %s219_s30, 4  ;;  %s945_s12 = scalar_lea.hbm %s1052_s2, %s504_s22  ;;  %s228_s10 = int_to_ptr.vmem [resolvable:$true] %s227_s10 }
  0x4b   : > { %s216_s7 = scalar_lea.sflag [#allocation8], %s874_s5  ;;  %s641_s9 = scalar_lea.hbm %s945_s12, 64 }
  0x4c   : > { %p642_p2 = scmp.ne.s32.totalorder %s945_s12, %s641_s9  ;;  %s646_s23 = scalar_lea.hbm %s1052_s2, 128 }
  0x4d   : > { %p647_p0 = scmp.lt.u32.totalorder %s945_s12, %s1052_s2  ;;  %p648_p13 = scmp.lt.u32.totalorder %s646_s23, %s641_s9 }
  0x4e   : > { %p644_p7 = pnand %p642_p2, %p613_p6  ;;  %p650_p1 = scmp.lt.u32.totalorder %s641_s9, %s945_s12 }
  0x4f   : > { %p649_p5 = por %p648_p13, %p647_p0 }
  0x50   : > { %p645_p8 = pneg %p644_p7 }
  0x51   : > { %p651_p9 = por %p650_p1, %p649_p5 }
  0x53   : > { %p652_p3 = pnand %p651_p9, %p645_p8 }
  0x55   : > { %655 = shalt.err (!%p652_p3)
}
  0x56   : > { %s656_s5 = scalar_lea.vmem %s228_s10, 64  ;;  %s765_s22 = smov [#allocation7]  }
  0x57   : > { %p657_p4 = scmp.ne.s32.totalorder %s228_s10, %s656_s5  ;;  %s661_s30 = sshll.u32 %s765_s22, 4  ;;  %s662_s30 = int_to_ptr.vmem [resolvable:$false] %s661_s30 }
  0x58   : > { %s663_s6 = scalar_lea.vmem %s662_s30, 128  ;;  %p664_p7 = scmp.lt.s32.totalorder %s228_s10, %s662_s30 }
  0x59   : > { %p659_p12 = pnand %p657_p4, %p613_p6  ;;  %p665_p11 = scmp.lt.s32.totalorder %s663_s6, %s656_s5 }
  0x5b   : > { %p660_p2 = pneg %p659_p12  ;;  %p666_p0 = por %p665_p11, %p664_p7 }
  0x5d   : > { %p667_p13 = pnand %p666_p0, %p660_p2 }
  0x5f   : > { %670 = shalt.err (!%p667_p13)
}
  0x60   : > { %536 = dma.hbm_to_vmem [thread:$0]  (!%p908_p10), %s945_s12, 64, %s228_s10, %s216_s7  }
  0x61   : > { %p1069_p8 = scmp.ne.s32.totalorder %s1065_s28, 0 }
  0x62   : > { %p1070_p5 = scmp.ne.s32.totalorder (!%p1069_p8), %s1061_s24, 0 }
  0x63   : > { %246 = sbr.rel (%p1069_p8) target bundleno = 182 (0xb6), region = 36 }
  0x6a   : > { %724 = dma.done.wait (%p1070_p5), [#allocation5], 32  }
  0x6b   : > { %726 = vsyncadd (%p1070_p5), [#allocation5], 4294967264  ;;  %s974_s9 = sand.u32 1, %s745_s16   ;;  %p1071_p11 = scmp.ne.s32.totalorder %s1062_s25, 0 }
  0x6c   : > { %s507_s11 = sshll.u32 %s974_s9, 3  ;;  %s253_s14 = scalar_lea.sflag [#allocation3], %s974_s9 }
  0x6d   : > { %s256_s13 = scalar_lea.vmem [#allocation6], %s507_s11 }
  0x6e   : > { %728 = dma.done.wait (%p1071_p11), %s253_s14, 128  }
  0x6f   : > { %730 = vsyncadd (%p1071_p11), %s253_s14, 4294967168  ;;  %s508_s28 = sshll.u32 %s974_s9, 2  ;;  %s262_s24 = scalar_lea.sflag [#allocation8], %s974_s9 }
  0x70   : > { %s265_s10 = scalar_lea.vmem [#allocation7], %s508_s28 }
  0x71   : > { %732 = dma.done.wait (%p1071_p11), %s262_s24, 64  }
  0x72   : > { %734 = vsyncadd (%p1071_p11), %s262_s24, 4294967232 }
  0x73   : > { %270 = sfence }
  0x74   : > { %v318_v0 = vld [vmem:[%s256_s13] sm:$0xff]  ;;  %s310_s12 = sshra.s32 %s753_s18, 7  ;;  %p302_p10 = scmp.lt.s32.totalorder %s753_s18, 1  ;;  %v319_v6 = vld [vmem:[%s265_s10] sm:$0xf] }
  0x75   : > { %v324_v1 = vand.u32 2147483647, %v318_v0  ;;  %s514_s7 = sshll.u32 %s310_s12, 7  ;;  %s315_s0 = sand.u32 127, %s753_s18  ;;  %v320_v9 = vunpack.c.l.bf16 %v319_v6  ;;  %v323_v19 = vmax.f32 %v318_v0, 0.0 }
  0x76   : > { %s303_s23 = scalar_select %p302_p10, %s753_s18, 1 }
  0x77   : > { %v325_v2 = vsub.f32 0.0, %v324_v1  ;;  %s515_s21 = sadd.s32 128, %s514_s7  ;;  %s309_s22 = sld [smem:[#allocation2 + %s753_s18]] }
  0x78   : > { %s316_s5 = sadd.s32 %s515_s21, %s315_s0  ;;  %s509_s25 = sshll.u32 %s303_s23, 2 }
  0x79   : > { %v326_v3 = vmul.f32 1.442695, %v325_v2  ;;  %s317_s30 = sld [smem:[#allocation2 + %s316_s5]]  ;;  %s308_s14 = scalar_lea.vmem %s1053_s3, %s509_s25 }
  0x7a   : > { %v321_v7 = vld [vmem:[%s308_s14] sm:$0xf]  ;;  %s301_s28 = scalar_lea.vmem [#allocation9], %s974_s9  ;;  %s511_s10 = sshll.u32 %s753_s18, 4 }
  0x7b   : > { %594 = vpow2.f32 %v326_v3  ;;  %v322_v10 = vunpack.c.l.bf16 %v321_v7  ;;  %s369_s24 = sshll.u32 %s301_s28, 4  ;;  %s1003_s23 = scalar_lea.hbm %s1054_s4, %s511_s10  ;;  %s998_s24 = int_to_ptr.vmem [resolvable:$true] %s369_s24 }
  0x7c   : > { %s356_s21 = scalar_lea.sflag [#allocation4], %s974_s9  ;;  %s671_s0 = scalar_lea.vmem %s998_s24, 16 }
  0x7d   : > { %v341_v11 = vstv %s309_s22  ;;  %p672_p6 = scmp.ne.s32.totalorder %s998_s24, %s671_s0  ;;  %p1072_p1 = scmp.ne.s32.totalorder %s1063_s26, 0 }
  0x7e   : > { %v342_v15 = vmul.f32 %v341_v11, %v320_v9  ;;  %s766_s18 = smov [#allocation9]  }
  0x7f   : > { %v343_v12 = vstv %s317_s30  ;;  %s338_s13 = sadd.f32 %s317_s30, %s309_s22  ;;  %p673_p9 = pnand %p672_p6, %p1072_p1 }
  0x80   : > { %v344_v16 = vmul.f32 %v343_v12, %v322_v10  ;;  %s675_s5 = sshll.u32 %s766_s18, 4  ;;  %s676_s5 = int_to_ptr.vmem [resolvable:$false] %s675_s5 }
  0x81   : > { %v339_v23 = vstv %s338_s13  ;;  %p674_p3 = pneg %p673_p9  ;;  %s677_s25 = scalar_lea.vmem %s676_s5, 32 }
  0x82   : > { %v345_v20 = vadd.f32 %v344_v16, %v342_v15  ;;  %p678_p4 = scmp.lt.s32.totalorder %s998_s24, %s676_s5  ;;  %p679_p12 = scmp.lt.s32.totalorder %s677_s25, %s671_s0 }
  0x84   : > { %v346_v25 = vmul.f32 %v345_v20, %v318_v0  ;;  %p680_p2 = por %p679_p12, %p678_p4 }
  0x85   : > { %v595_v4 = vpop.eup %594 }
  0x86   : > { %v328_v5 = vadd.f32 1.0, %v595_v4  ;;  %v331_v8 = vmul.f32 -0.5, %v595_v4  ;;  %v334_v14 = vand.u32 2147483647, %v595_v4  ;;  %p681_p7 = pnand %p680_p2, %p674_p3 }
  0x88   : > { %596 = vlog2.f32 %v328_v5  ;;  %v332_v13 = vadd.f32 1.0, %v331_v8  ;;  %vm335_vm0 = vcmp.lt.f32.partialorder %v334_v14, 0.0004427343 }
  0x8a   : > { %v333_v17 = vmul.f32 %v595_v4, %v332_v13 }
  0x92   : > { %v597_v18 = vpop.eup %596 }
  0x93   : > { %v330_v21 = vmul.f32 0.6931472, %v597_v18 }
  0x95   : > { %v336_v22 = vsel %vm335_vm0, %v333_v17, %v330_v21 }
  0x96   : > { %v337_v24 = vadd.f32 %v336_v22, %v323_v19 }
  0x98   : > { %v340_v26 = vmul.f32 %v339_v23, %v337_v24 }
  0x9a   : > { %v347_v27 = vsub.f32 %v340_v26, %v346_v25 }
  0x9c   : > { %v348_v28 = vrot.slane %v347_v27, 4 }
  0x9e   : > { %v349_v29 = vadd.f32 %v348_v28, %v347_v27 }
  0xa0   : > { %v350_v30 = vrot.slane %v349_v29, 2 }
  0xa2   : > { %v351_v31 = vadd.f32 %v350_v30, %v349_v29 }
  0xa4   : > { %v352_v32 = vrot.slane %v351_v31, 1 }
  0xa6   : > { %v353_v33 = vadd.f32 %v352_v32, %v351_v31 }
  0xa8   : > { %354 = vst [vmem:[%s301_s28] sm:$0x1] %v353_v33 }
  0xa9   : > { %684 = shalt.err (!%p681_p7)
}
  0xaa   : > { %s685_s9 = scalar_lea.hbm %s1003_s23, 16  ;;  %s689_s6 = scalar_lea.hbm %s1054_s4, 32 }
  0xab   : > { %p686_p0 = scmp.ne.s32.totalorder %s1003_s23, %s685_s9  ;;  %p690_p5 = scmp.lt.u32.totalorder %s1003_s23, %s1054_s4 }
  0xac   : > { %p691_p11 = scmp.lt.u32.totalorder %s689_s6, %s685_s9  ;;  %p693_p6 = scmp.lt.u32.totalorder %s685_s9, %s1003_s23 }
  0xad   : > { %p687_p13 = pnand %p686_p0, %p1072_p1 }
  0xae   : > { %p692_p10 = por %p691_p11, %p690_p5 }
  0xaf   : > { %p688_p8 = pneg %p687_p13 }
  0xb0   : > { %p694_p9 = por %p693_p6, %p692_p10 }
  0xb2   : > { %p695_p3 = pnand %p694_p9, %p688_p8 }
  0xb4   : > { %698 = shalt.err (!%p695_p3)
}
  0xb5   : > { %524 = dma.vmem_to_hbm [thread:$0]  (%p1072_p1), %s998_s24, 16, %s1003_s23, %s356_s21  }
  0xb6 PF: > { %s381_s13 = sand.u32 1, %s741_s15   ;;  %p1073_p4 = scmp.ne.s32.totalorder %s1064_s27, 0 }
  0xb7   : > { %p1074_p12 = scmp.ge.s32.totalorder %s761_s20, 2  ;;  %s382_s28 = scalar_lea.sflag [#allocation4], %s381_s13 }
  0xb9   : > { %p538_p2 = pnand %p1074_p12, %p1073_p4 }
  0xbb   : > { %736 = dma.done.wait (!%p538_p2), %s382_s28, 16  }
  0xbc   : > { %738 = vsyncadd (!%p538_p2), %s382_s28, 4294967280  ;;  %s24_s20 = sadd.s32 1, %s761_s20   ;;  %s1075_s15 = smov %s745_s16 }
  0xbd   : > { %p21_p7 = scmp.ge.s32.totalorder %s24_s20, 4   ;;  %s1076_s16 = smov %s749_s17 }
  0xbe   : > { %s1077_s17 = smov %s895_s8  ;;  %s1078_s18 = smov %s757_s19 }
  0xbf   : > { %s1079_s19 = smov %s1081_s29  ;;  %23 = sbr.rel (!%p21_p7) target bundleno = 11 (0xb), region = 102 }
  0xc6   :  { %386 = vsyncpa [#allocation3], 1 }
  0xc7   :  { %388 = vsyncpa [#allocation3 + $0x1], 1 }
  0xc8   :  { %389 = vsyncpa [#allocation8], 1 }
  0xc9   :  { %391 = vsyncpa [#allocation8 + $0x1], 1 }
  0xca   :  { %392 = vsyncpa [#allocation4], 1 }
  0xcb   :  { %394 = vsyncpa [#allocation4 + $0x1], 1 }
  0xcc   :  { %395 = vsyncpa [#allocation5], 1 }
  0xcd   :  { %397 = vsyncpa [#allocation5 + $0x1], 1 }

</bundles_post_ra>
